<compile_context>
chip_gen: v7x
topology: tpu7x:2x2x1
jax: 0.10.0
libtpu: 0.0.40
codegen_flags: <defaults>
</compile_context>

<pallas_src>
import functools

import jax
import jax.numpy as jnp
from jax import lax
from jax.experimental import pallas as pl
from jax.experimental.pallas import tpu as pltpu


_NUM_CLASS_PAD = 128   # lane-dense padded output width (13 -> 128)
_MAX_TILE_B = 256      # batch tile; sized well under v7x's 64 MiB VMEM


def _round_up(x, m):
    return (x + m - 1) // m * m


# ----------------------------- Pallas kernel ------------------------------- #

def _fused_mlp_kernel(ids_ref, xae_ref,
                      w1a_ref, w1c_ref, b1_ref,
                      w2_ref, b2_ref,
                      w3_ref, b3_ref,
                      o_ref, *, cat_offsets, onehot_k):
    """Embeddings (one-hot vs. emb-folded W1) + Linear(160,512)+ReLU ->
    Linear(512,256)+ReLU -> Linear(256,128-padded)+Sigmoid."""
    tb = ids_ref.shape[0]
    ids = ids_ref[...]                                            # [TB, 4] int32

    # Combined one-hot over the concatenated categorical vocabulary
    # (columns [off_j, off_j + num_cat_j) belong to table j; padded cols stay 0).
    col = lax.broadcasted_iota(jnp.int32, (tb, onehot_k), 1)
    oh = col == (ids[:, 0:1] + cat_offsets[0])
    for j in range(1, 4):
        oh = oh | (col == (ids[:, j:j + 1] + cat_offsets[j]))
    oh = oh.astype(jnp.bfloat16)                                  # [TB, K]

    x = xae_ref[...].astype(jnp.bfloat16)                         # [TB, 128]

    # Layer 1: x_ae @ W1[:128] + onehot @ (emb-folded W1[128:]) + b1, ReLU.
    h1 = (jnp.dot(x, w1a_ref[...], preferred_element_type=jnp.float32)
          + jnp.dot(oh, w1c_ref[...], preferred_element_type=jnp.float32)
          + b1_ref[...])
    h1 = jnp.maximum(h1, 0.0)
    # TODO(synk): nn.Dropout(0.3)/(0.2) are inference-mode identities; no
    # stochastic masking is emitted (would need pltpu.prng_* for training).

    h2 = jnp.dot(h1.astype(jnp.bfloat16), w2_ref[...],
                 preferred_element_type=jnp.float32) + b2_ref[...]
    h2 = jnp.maximum(h2, 0.0)

    logits = jnp.dot(h2.astype(jnp.bfloat16), w3_ref[...],
                     preferred_element_type=jnp.float32) + b3_ref[...]

    # Sigmoid = 1 / (1 + exp(-x)); both exp and the approx reciprocal go to EUP.
    o_ref[...] = pl.reciprocal(1.0 + jnp.exp(-logits), approx=True)


# --------------------------- Params & preparation --------------------------- #

def init_params(key, ae_feature_dim=128, num_class=13,
                num_cat1=10, num_cat2=10, num_cat3=10, num_cat4=10, embed_dim=8):
    """PyTorch-equivalent parameters (f32, linear weights stored [in, out])."""
    in_dim = ae_feature_dim + 4 * embed_dim
    ks = jax.random.split(key, 10)

    def linear(kw, kb, fan_in, fan_out):
        bound = 1.0 / jnp.sqrt(fan_in)
        w = jax.random.uniform(kw, (fan_in, fan_out), jnp.float32, -bound, bound)
        b = jax.random.uniform(kb, (1, fan_out), jnp.float32, -bound, bound)
        return w, b

    params = {
        "emb1": jax.random.normal(ks[0], (num_cat1, embed_dim), jnp.float32),
        "emb2": jax.random.normal(ks[1], (num_cat2, embed_dim), jnp.float32),
        "emb3": jax.random.normal(ks[2], (num_cat3, embed_dim), jnp.float32),
        "emb4": jax.random.normal(ks[3], (num_cat4, embed_dim), jnp.float32),
    }
    params["w1"], params["b1"] = linear(ks[4], ks[5], in_dim, 512)
    params["w2"], params["b2"] = linear(ks[6], ks[7], 512, 256)
    params["w3"], params["b3"] = linear(ks[8], ks[9], 256, num_class)
    return params


def prepare_inference_params(params):
    """One-time weight prep (call once, outside the per-call path):
    fold embedding tables into W1, cast matmul weights to bf16, pad the
    output layer to a lane-dense 128-wide N (padded columns zero)."""
    embed_dim = params["emb1"].shape[1]
    num_cats = [params[f"emb{j}"].shape[0] for j in (1, 2, 3, 4)]
    w1 = params["w1"]                                   # [in_dim, 512] f32
    ae_feature_dim = w1.shape[0] - 4 * embed_dim

    w1_ae = w1[:ae_feature_dim]                         # [128, 512]

    folded = []
    for j in range(4):
        lo = ae_feature_dim + j * embed_dim
        sl = w1[lo:lo + embed_dim]                      # [embed_dim, 512]
        folded.append(params[f"emb{j + 1}"] @ sl)       # [num_cat_j, 512]
    w1_cat = jnp.concatenate(folded, axis=0)            # [sum(num_cats), 512]

    total_vocab = sum(num_cats)
    onehot_k = max(_round_up(total_vocab, 64), 64)
    w1_cat = jnp.pad(w1_cat, ((0, onehot_k - total_vocab), (0, 0)))

    offsets = []
    acc = 0
    for n in num_cats:
        offsets.append(acc)
        acc += n

    w3, b3 = params["w3"], params["b3"]
    num_class = w3.shape[1]
    w3_pad = jnp.pad(w3, ((0, 0), (0, _NUM_CLASS_PAD - num_class)))
    b3_pad = jnp.pad(b3, ((0, 0), (0, _NUM_CLASS_PAD - num_class)))

    return {
        "w1_ae": w1_ae.astype(jnp.bfloat16),
        "w1_cat": w1_cat.astype(jnp.bfloat16),
        "b1": params["b1"],
        "w2": params["w2"].astype(jnp.bfloat16),
        "b2": params["b2"],
        "w3": w3_pad.astype(jnp.bfloat16),
        "b3": b3_pad,
        "cat_offsets": tuple(offsets),
        "onehot_k": onehot_k,
        "num_class": num_class,
        "ae_feature_dim": ae_feature_dim,
    }


# --------------------------------- Forward ---------------------------------- #

def cxr_forward(prepped, x_ae, cat_ids):
    """x_ae: [B, 128] f32; cat_ids: [B, 4] int.  Returns [B, num_class] f32."""
    B = x_ae.shape[0]
    feat = x_ae.shape[1]

    # Pad batch to a sublane-friendly tile; tile larger batches at 256 rows.
    if B <= _MAX_TILE_B:
        tile_b = max(_round_up(B, 8), 8)
        b_pad = tile_b
    else:
        tile_b = _MAX_TILE_B
        b_pad = _round_up(B, tile_b)
    if b_pad != B:
        x_ae = jnp.pad(x_ae, ((0, b_pad - B), (0, 0)))
        cat_ids = jnp.pad(cat_ids, ((0, b_pad - B), (0, 0)))
    cat_ids = cat_ids.astype(jnp.int32)

    kernel = functools.partial(_fused_mlp_kernel,
                               cat_offsets=prepped["cat_offsets"],
                               onehot_k=prepped["onehot_k"])

    def batch_spec(f):
        return pl.BlockSpec((tile_b, f), lambda i: (i, 0))

    def resident_spec(arr):
        return pl.BlockSpec(arr.shape, lambda i: (0, 0))

    out_pad = pl.pallas_call(
        kernel,
        out_shape=jax.ShapeDtypeStruct((b_pad, _NUM_CLASS_PAD), jnp.float32),
        grid=(b_pad // tile_b,),
        in_specs=[
            batch_spec(4),
            batch_spec(feat),
            resident_spec(prepped["w1_ae"]),
            resident_spec(prepped["w1_cat"]),
            resident_spec(prepped["b1"]),
            resident_spec(prepped["w2"]),
            resident_spec(prepped["b2"]),
            resident_spec(prepped["w3"]),
            resident_spec(prepped["b3"]),
        ],
        out_specs=batch_spec(_NUM_CLASS_PAD),
        compiler_params=pltpu.CompilerParams(
            dimension_semantics=("parallel",)),
    )(cat_ids, x_ae,
      prepped["w1_ae"], prepped["w1_cat"], prepped["b1"],
      prepped["w2"], prepped["b2"],
      prepped["w3"], prepped["b3"])

    return out_pad[:B, :prepped["num_class"]]


def multi_input_cxr_classifier(params, x_ae, cat_ids):
    """Convenience wrapper matching the PyTorch module's forward signature.
    For repeated inference, hoist prepare_inference_params out of the call."""
    return cxr_forward(prepare_inference_params(params), x_ae, cat_ids)


# -------------------------------- Reference --------------------------------- #

def _reference(params, x_ae, cat_ids):
    """Pure-JAX f32 reference (mirrors the PyTorch module exactly)."""
    e1 = jnp.take(params["emb1"], cat_ids[:, 0], axis=0)
    e2 = jnp.take(params["emb2"], cat_ids[:, 1], axis=0)
    e3 = jnp.take(params["emb3"], cat_ids[:, 2], axis=0)
    e4 = jnp.take(params["emb4"], cat_ids[:, 3], axis=0)
    x = jnp.concatenate([x_ae, e1, e2, e3, e4], axis=1)
    h1 = jnp.maximum(x @ params["w1"] + params["b1"], 0.0)
    h2 = jnp.maximum(h1 @ params["w2"] + params["b2"], 0.0)
    return jax.nn.sigmoid(h2 @ params["w3"] + params["b3"])


# ---------------------------------- main ------------------------------------ #

if __name__ == "__main__":
    key = jax.random.PRNGKey(0)
    k_params, k_x, k_cat = jax.random.split(key, 3)

    B = 4
    ae_feature_dim = 128
    num_class = 13

    params = init_params(k_params, ae_feature_dim=ae_feature_dim, num_class=num_class)
    prepped = prepare_inference_params(params)   # one-time weight prep

    x_ae = jax.random.normal(k_x, (B, ae_feature_dim), jnp.float32)
    cat_ids = jax.random.randint(k_cat, (B, 4), 0, 10, dtype=jnp.int32)

    out = jax.block_until_ready(cxr_forward(prepped, x_ae, cat_ids))
    ref = jax.block_until_ready(_reference(params, x_ae, cat_ids))

    assert out.shape == (B, num_class), out.shape
    max_err = float(jnp.max(jnp.abs(out - ref)))
    # bf16 matmul operands + approximate reciprocal => compare loosely vs f32 ref.
    assert max_err < 2e-2, f"mismatch vs reference: max abs err {max_err}"
    print("KERNEL_OK")
</pallas_src>

<mosaic_0001>
module attributes {stable_mosaic.version = 11 : i64} {
  func.func @_fused_mlp_kernel(%arg0: i32, %arg1: memref<8x4xi32, #tpu.memory_space<vmem>>, %arg2: memref<8x128xf32, #tpu.memory_space<vmem>>, %arg3: memref<128x512xbf16, #tpu.memory_space<vmem>>, %arg4: memref<64x512xbf16, #tpu.memory_space<vmem>>, %arg5: memref<1x512xf32, #tpu.memory_space<vmem>>, %arg6: memref<512x256xbf16, #tpu.memory_space<vmem>>, %arg7: memref<1x256xf32, #tpu.memory_space<vmem>>, %arg8: memref<256x128xbf16, #tpu.memory_space<vmem>>, %arg9: memref<1x128xf32, #tpu.memory_space<vmem>>, %arg10: memref<8x128xf32, #tpu.memory_space<vmem>>) attributes {dimension_semantics = [#tpu.dimension_semantics<parallel>], iteration_bounds = array<i64: 1>, scalar_prefetch = 0 : i64, scratch_operands = 0 : i64, tpu.core_type = #tpu.core_type<tc>, window_params = [{transform_indices = @transform_0, window_bounds = array<i64: 8, 4>}, {transform_indices = @transform_1, window_bounds = array<i64: 8, 128>}, {pipeline_mode = #tpu.pipeline_mode<synchronous>, transform_indices = @transform_2, window_bounds = array<i64: 128, 512>}, {pipeline_mode = #tpu.pipeline_mode<synchronous>, transform_indices = @transform_3, window_bounds = array<i64: 64, 512>}, {pipeline_mode = #tpu.pipeline_mode<synchronous>, transform_indices = @transform_4, window_bounds = array<i64: 1, 512>}, {pipeline_mode = #tpu.pipeline_mode<synchronous>, transform_indices = @transform_5, window_bounds = array<i64: 512, 256>}, {pipeline_mode = #tpu.pipeline_mode<synchronous>, transform_indices = @transform_6, window_bounds = array<i64: 1, 256>}, {pipeline_mode = #tpu.pipeline_mode<synchronous>, transform_indices = @transform_7, window_bounds = array<i64: 256, 128>}, {pipeline_mode = #tpu.pipeline_mode<synchronous>, transform_indices = @transform_8, window_bounds = array<i64: 1, 128>}, {transform_indices = @transform_9, window_bounds = array<i64: 8, 128>}]} {
    %c0 = arith.constant 0 : index
    %c0_0 = arith.constant 0 : index
    %0 = vector.load %arg1[%c0, %c0_0] : memref<8x4xi32, #tpu.memory_space<vmem>>, vector<8x4xi32>
    %1 = tpu.iota {dimensions = array<i32: 1>} : vector<8x64xi32>
    %2 = vector.extract_strided_slice %0 {offsets = [0, 0], sizes = [8, 1], strides = [1, 1]} : vector<8x4xi32> to vector<8x1xi32>
    %c0_i32 = arith.constant 0 : i32
    %3 = vector.broadcast %c0_i32 : i32 to vector<8x1xi32>
    %4 = arith.addi %2, %3 : vector<8x1xi32>
    %5 = vector.broadcast %4 : vector<8x1xi32> to vector<8x64xi32>
    %6 = arith.cmpi eq, %1, %5 : vector<8x64xi32>
    %7 = vector.extract_strided_slice %0 {offsets = [0, 1], sizes = [8, 1], strides = [1, 1]} : vector<8x4xi32> to vector<8x1xi32>
    %c10_i32 = arith.constant 10 : i32
    %8 = vector.broadcast %c10_i32 : i32 to vector<8x1xi32>
    %9 = arith.addi %7, %8 : vector<8x1xi32>
    %10 = vector.broadcast %9 : vector<8x1xi32> to vector<8x64xi32>
    %11 = arith.cmpi eq, %1, %10 : vector<8x64xi32>
    %12 = arith.ori %6, %11 : vector<8x64xi1>
    %13 = vector.extract_strided_slice %0 {offsets = [0, 2], sizes = [8, 1], strides = [1, 1]} : vector<8x4xi32> to vector<8x1xi32>
    %c20_i32 = arith.constant 20 : i32
    %14 = vector.broadcast %c20_i32 : i32 to vector<8x1xi32>
    %15 = arith.addi %13, %14 : vector<8x1xi32>
    %16 = vector.broadcast %15 : vector<8x1xi32> to vector<8x64xi32>
    %17 = arith.cmpi eq, %1, %16 : vector<8x64xi32>
    %18 = arith.ori %12, %17 : vector<8x64xi1>
    %19 = vector.extract_strided_slice %0 {offsets = [0, 3], sizes = [8, 1], strides = [1, 1]} : vector<8x4xi32> to vector<8x1xi32>
    %c30_i32 = arith.constant 30 : i32
    %20 = vector.broadcast %c30_i32 : i32 to vector<8x1xi32>
    %21 = arith.addi %19, %20 : vector<8x1xi32>
    %22 = vector.broadcast %21 : vector<8x1xi32> to vector<8x64xi32>
    %23 = arith.cmpi eq, %1, %22 : vector<8x64xi32>
    %24 = arith.ori %18, %23 : vector<8x64xi1>
    %25 = arith.extui %24 : vector<8x64xi1> to vector<8x64xi32>
    %26 = arith.sitofp %25 : vector<8x64xi32> to vector<8x64xf32>
    %27 = arith.truncf %26 : vector<8x64xf32> to vector<8x64xbf16>
    %c0_1 = arith.constant 0 : index
    %c0_2 = arith.constant 0 : index
    %28 = vector.load %arg2[%c0_1, %c0_2] : memref<8x128xf32, #tpu.memory_space<vmem>>, vector<8x128xf32>
    %29 = arith.truncf %28 : vector<8x128xf32> to vector<8x128xbf16>
    %c0_3 = arith.constant 0 : index
    %c0_4 = arith.constant 0 : index
    %30 = vector.load %arg3[%c0_3, %c0_4] : memref<128x512xbf16, #tpu.memory_space<vmem>>, vector<128x512xbf16>
    %cst = arith.constant dense<0.000000e+00> : vector<8x512xf32>
    %31 = tpu.matmul %29, %30, %cst {dimension_numbers = #tpu.dot_dimension_numbers<[1], [0], [0], [1], [0, 0, 1, 1], [], []>} : vector<8x128xbf16>, vector<128x512xbf16>, vector<8x512xf32> -> vector<8x512xf32>
    %c0_5 = arith.constant 0 : index
    %c0_6 = arith.constant 0 : index
    %32 = vector.load %arg4[%c0_5, %c0_6] : memref<64x512xbf16, #tpu.memory_space<vmem>>, vector<64x512xbf16>
    %cst_7 = arith.constant dense<0.000000e+00> : vector<8x512xf32>
    %33 = tpu.matmul %27, %32, %cst_7 {dimension_numbers = #tpu.dot_dimension_numbers<[1], [0], [0], [1], [0, 0, 1, 1], [], []>} : vector<8x64xbf16>, vector<64x512xbf16>, vector<8x512xf32> -> vector<8x512xf32>
    %34 = arith.addf %31, %33 : vector<8x512xf32>
    %c0_8 = arith.constant 0 : index
    %c0_9 = arith.constant 0 : index
    %35 = vector.load %arg5[%c0_8, %c0_9] : memref<1x512xf32, #tpu.memory_space<vmem>>, vector<1x512xf32>
    %36 = vector.broadcast %35 : vector<1x512xf32> to vector<8x512xf32>
    %37 = arith.addf %34, %36 : vector<8x512xf32>
    %cst_10 = arith.constant 0.000000e+00 : f32
    %38 = vector.broadcast %cst_10 : f32 to vector<8x512xf32>
    %39 = arith.maximumf %37, %38 : vector<8x512xf32>
    %40 = arith.truncf %39 : vector<8x512xf32> to vector<8x512xbf16>
    %c0_11 = arith.constant 0 : index
    %c0_12 = arith.constant 0 : index
    %41 = vector.load %arg6[%c0_11, %c0_12] : memref<512x256xbf16, #tpu.memory_space<vmem>>, vector<512x256xbf16>
    %cst_13 = arith.constant dense<0.000000e+00> : vector<8x256xf32>
    %42 = tpu.matmul %40, %41, %cst_13 {dimension_numbers = #tpu.dot_dimension_numbers<[1], [0], [0], [1], [0, 0, 1, 1], [], []>} : vector<8x512xbf16>, vector<512x256xbf16>, vector<8x256xf32> -> vector<8x256xf32>
    %c0_14 = arith.constant 0 : index
    %c0_15 = arith.constant 0 : index
    %43 = vector.load %arg7[%c0_14, %c0_15] : memref<1x256xf32, #tpu.memory_space<vmem>>, vector<1x256xf32>
    %44 = vector.broadcast %43 : vector<1x256xf32> to vector<8x256xf32>
    %45 = arith.addf %42, %44 : vector<8x256xf32>
    %cst_16 = arith.constant 0.000000e+00 : f32
    %46 = vector.broadcast %cst_16 : f32 to vector<8x256xf32>
    %47 = arith.maximumf %45, %46 : vector<8x256xf32>
    %48 = arith.truncf %47 : vector<8x256xf32> to vector<8x256xbf16>
    %c0_17 = arith.constant 0 : index
    %c0_18 = arith.constant 0 : index
    %49 = vector.load %arg8[%c0_17, %c0_18] : memref<256x128xbf16, #tpu.memory_space<vmem>>, vector<256x128xbf16>
    %cst_19 = arith.constant dense<0.000000e+00> : vector<8x128xf32>
    %50 = tpu.matmul %48, %49, %cst_19 {dimension_numbers = #tpu.dot_dimension_numbers<[1], [0], [0], [1], [0, 0, 1, 1], [], []>} : vector<8x256xbf16>, vector<256x128xbf16>, vector<8x128xf32> -> vector<8x128xf32>
    %c0_20 = arith.constant 0 : index
    %c0_21 = arith.constant 0 : index
    %51 = vector.load %arg9[%c0_20, %c0_21] : memref<1x128xf32, #tpu.memory_space<vmem>>, vector<1x128xf32>
    %52 = vector.broadcast %51 : vector<1x128xf32> to vector<8x128xf32>
    %53 = arith.addf %50, %52 : vector<8x128xf32>
    %cst_22 = arith.constant 0.000000e+00 : f32
    %54 = vector.broadcast %cst_22 : f32 to vector<8x128xf32>
    %55 = arith.subf %54, %53 : vector<8x128xf32>
    %56 = math.exp %55 : vector<8x128xf32>
    %cst_23 = arith.constant 1.000000e+00 : f32
    %57 = vector.broadcast %cst_23 : f32 to vector<8x128xf32>
    %58 = arith.addf %57, %56 : vector<8x128xf32>
    %59 = tpu.reciprocal %58 {approx = true} : vector<8x128xf32> -> vector<8x128xf32>
    %c0_24 = arith.constant 0 : index
    %c0_25 = arith.constant 0 : index
    %60 = vector.load %arg10[%c0_24, %c0_25] : memref<8x128xf32, #tpu.memory_space<vmem>>, vector<8x128xf32>
    tpu.vector_store %arg10[%c0_24, %c0_25], %59 {strides = array<i32>} : memref<8x128xf32, #tpu.memory_space<vmem>>, vector<8x128xf32>,
    return
  }
  func.func @transform_0(%arg0: i32) -> (i32, i32) {
    %c0_i32 = arith.constant 0 : i32
    %c0_i32_0 = arith.constant 0 : i32
    return %arg0, %c0_i32 : i32, i32
  }
  func.func @transform_1(%arg0: i32) -> (i32, i32) {
    %c0_i32 = arith.constant 0 : i32
    %c0_i32_0 = arith.constant 0 : i32
    return %arg0, %c0_i32 : i32, i32
  }
  func.func @transform_2(%arg0: i32) -> (i32, i32) {
    %c0_i32 = arith.constant 0 : i32
    %c0_i32_0 = arith.constant 0 : i32
    %c0_i32_1 = arith.constant 0 : i32
    return %c0_i32, %c0_i32_0 : i32, i32
  }
  func.func @transform_3(%arg0: i32) -> (i32, i32) {
    %c0_i32 = arith.constant 0 : i32
    %c0_i32_0 = arith.constant 0 : i32
    %c0_i32_1 = arith.constant 0 : i32
    return %c0_i32, %c0_i32_0 : i32, i32
  }
  func.func @transform_4(%arg0: i32) -> (i32, i32) {
    %c0_i32 = arith.constant 0 : i32
    %c0_i32_0 = arith.constant 0 : i32
    %c0_i32_1 = arith.constant 0 : i32
    return %c0_i32, %c0_i32_0 : i32, i32
  }
  func.func @transform_5(%arg0: i32) -> (i32, i32) {
    %c0_i32 = arith.constant 0 : i32
    %c0_i32_0 = arith.constant 0 : i32
    %c0_i32_1 = arith.constant 0 : i32
    return %c0_i32, %c0_i32_0 : i32, i32
  }
  func.func @transform_6(%arg0: i32) -> (i32, i32) {
    %c0_i32 = arith.constant 0 : i32
    %c0_i32_0 = arith.constant 0 : i32
    %c0_i32_1 = arith.constant 0 : i32
    return %c0_i32, %c0_i32_0 : i32, i32
  }
  func.func @transform_7(%arg0: i32) -> (i32, i32) {
    %c0_i32 = arith.constant 0 : i32
    %c0_i32_0 = arith.constant 0 : i32
    %c0_i32_1 = arith.constant 0 : i32
    return %c0_i32, %c0_i32_0 : i32, i32
  }
  func.func @transform_8(%arg0: i32) -> (i32, i32) {
    %c0_i32 = arith.constant 0 : i32
    %c0_i32_0 = arith.constant 0 : i32
    %c0_i32_1 = arith.constant 0 : i32
    return %c0_i32, %c0_i32_0 : i32, i32
  }
  func.func @transform_9(%arg0: i32) -> (i32, i32) {
    %c0_i32 = arith.constant 0 : i32
    %c0_i32_0 = arith.constant 0 : i32
    return %arg0, %c0_i32 : i32, i32
  }
}

</mosaic_0001>

<bundles_post_ra>
// kernel: tpu_custom_call.1
= control target key start
LH: loop header
LB: loop body
LE: loop exit
PB: predicated region body
PF: predicated region fallthrough
CT: control target
= control target key end

     0   :  { %14 = vsyncpa [#allocation3], 0  ;;  %s1956_s0 = inlined_call_operand.vmem [shape: s32[8,4], index: 0, kind: input, shape index: {}]   ;;  %s1957_s1 = inlined_call_operand.vmem [shape: f32[8,128], index: 1, kind: input, shape index: {}]   ;;  %s1958_s2 = inlined_call_operand.hbm [shape: bf16[128,512], index: 2, kind: input, shape index: {}]   ;;  %s1959_s3 = inlined_call_operand.hbm [shape: bf16[64,512], index: 3, kind: input, shape index: {}]   ;;  %s1960_s4 = inlined_call_operand.vmem [shape: f32[1,512], index: 4, kind: input, shape index: {}]   ;;  %s1961_s5 = inlined_call_operand.hbm [shape: bf16[512,256], index: 5, kind: input, shape index: {}]   ;;  %s1962_s6 = inlined_call_operand.vmem [shape: f32[1,256], index: 6, kind: input, shape index: {}]   ;;  %s1963_s7 = inlined_call_operand.hbm [shape: bf16[256,128], index: 7, kind: input, shape index: {}]   ;;  %s1964_s8 = inlined_call_operand.vmem [shape: f32[1,128], index: 8, kind: input, shape index: {}]   ;;  %s1965_s9 = inlined_call_operand.hbm [shape: f32[8,128], index: 9, kind: output, shape index: {}]  }
   0x1   :  { %15 = vsyncpa [#allocation6], 0 }
   0x2   :  { %16 = vsyncpa [#allocation9], 0 }
   0x3   :  { %17 = vsyncpa [#allocation4], 0  ;;  %s1776_s30 = smov [#allocation5]   ;;  %s1777_s11 = smov [#allocation2]  }
   0x4   :  { %s39_s10 = sshll.u32 %s1776_s30, 4  ;;  %s27_s12 = sshll.u32 %s1777_s11, 4  ;;  %s40_s10 = int_to_ptr.vmem [resolvable:$true] %s39_s10  ;;  %s1842_s12 = int_to_ptr.vmem [resolvable:$true] %s27_s12 }
   0x5   :  { %s1658_s15 = scalar_lea.hbm %s1959_s3, 2048 }
   0x6   :  { %p1659_p0 = scmp.ne.s32.totalorder %s1959_s3, %s1658_s15  ;;  %p1662_p1 = scmp.lt.u32.totalorder %s1658_s15, %s1959_s3 }
   0x8   :  { %p1664_p2 = pnand %p1662_p1, %p1659_p0 }
   0xa   :  { %1667 = shalt.err (!%p1664_p2)
}
   0xb   :  { %s1668_s20 = scalar_lea.vmem %s40_s10, 2048  ;;  %p1673_p4 = scmp.lt.s32.totalorder %s40_s10, %s40_s10 }
   0xc   :  { %p1669_p3 = scmp.ne.s32.totalorder %s40_s10, %s1668_s20  ;;  %p1674_p5 = scmp.lt.s32.totalorder %s1668_s20, %s1668_s20 }
   0xe   :  { %p1675_p6 = por %p1674_p5, %p1673_p4 }
  0x10   :  { %p1676_p7 = pnand %p1675_p6, %p1669_p3 }
  0x12   :  { %1679 = shalt.err (!%p1676_p7)
}
  0x13   :  { %s1778_s21 = smov 256   ;;  %s1779_s22 = smov 16  }
  0x14   :  { %45 = dma.hbm_to_vmem [thread:$0]  %s1959_s3, 2048, %s40_s10, [#allocation6], %s1778_s21, %s1778_s21, %s1779_s22  }
  0x15   :  { %s1680_s27 = scalar_lea.hbm %s1958_s2, 4096 }
  0x16   :  { %p1681_p8 = scmp.ne.s32.totalorder %s1958_s2, %s1680_s27  ;;  %p1684_p9 = scmp.lt.u32.totalorder %s1680_s27, %s1958_s2 }
  0x18   :  { %p1686_p10 = pnand %p1684_p9, %p1681_p8 }
  0x1a   :  { %1689 = shalt.err (!%p1686_p10)
}
  0x1b   :  { %s1690_s13 = scalar_lea.vmem %s1842_s12, 4096  ;;  %p1695_p12 = scmp.lt.s32.totalorder %s1842_s12, %s1842_s12 }
  0x1c   :  { %p1691_p11 = scmp.ne.s32.totalorder %s1842_s12, %s1690_s13  ;;  %p1696_p13 = scmp.lt.s32.totalorder %s1690_s13, %s1690_s13 }
  0x1e   :  { %p1697_p0 = por %p1696_p13, %p1695_p12 }
  0x20   :  { %p1698_p1 = pnand %p1697_p0, %p1691_p11 }
  0x22   :  { %1701 = shalt.err (!%p1698_p1)
}
  0x23   :  { %33 = dma.hbm_to_vmem [thread:$0]  %s1958_s2, 4096, %s1842_s12, [#allocation3], %s1778_s21, %s1778_s21, %s1779_s22  }
  0x24   :  { %s1780_s14 = smov [#allocation7]   ;;  %s1702_s18 = scalar_lea.hbm %s1961_s5, 8192 }
  0x25   :  { %s53_s15 = sshll.u32 %s1780_s14, 4  ;;  %p1703_p2 = scmp.ne.s32.totalorder %s1961_s5, %s1702_s18  ;;  %s54_s15 = int_to_ptr.vmem [resolvable:$true] %s53_s15 }
  0x26   :  { %p1706_p3 = scmp.lt.u32.totalorder %s1702_s18, %s1961_s5 }
  0x28   :  { %p1708_p4 = pnand %p1706_p3, %p1703_p2 }
  0x2a   :  { %1711 = shalt.err (!%p1708_p4)
}
  0x2b   :  { %s1712_s25 = scalar_lea.vmem %s54_s15, 8192  ;;  %p1717_p6 = scmp.lt.s32.totalorder %s54_s15, %s54_s15 }
  0x2c   :  { %p1713_p5 = scmp.ne.s32.totalorder %s54_s15, %s1712_s25  ;;  %p1718_p7 = scmp.lt.s32.totalorder %s1712_s25, %s1712_s25 }
  0x2e   :  { %p1719_p8 = por %p1718_p7, %p1717_p6 }
  0x30   :  { %p1720_p9 = pnand %p1719_p8, %p1713_p5 }
  0x32   :  { %1723 = shalt.err (!%p1720_p9)
}
  0x33   :  { %s1781_s2 = smov 128   ;;  %s1782_s12 = smov 8  }
  0x34   :  { %59 = dma.hbm_to_vmem [thread:$0]  %s1961_s5, 8192, %s54_s15, [#allocation6], %s1781_s2, %s1781_s2, %s1782_s12  }
  0x35   :  { %s1783_s26 = smov [#allocation8]   ;;  %s1724_s30 = scalar_lea.hbm %s1963_s7, 2048 }
  0x36   :  { %s67_s27 = sshll.u32 %s1783_s26, 4  ;;  %p1725_p10 = scmp.ne.s32.totalorder %s1963_s7, %s1724_s30  ;;  %s68_s27 = int_to_ptr.vmem [resolvable:$true] %s67_s27 }
  0x37   :  { %p1728_p11 = scmp.lt.u32.totalorder %s1724_s30, %s1963_s7 }
  0x39   :  { %p1730_p12 = pnand %p1728_p11, %p1725_p10 }
  0x3b   :  { %1733 = shalt.err (!%p1730_p12)
}
  0x3c   :  { %s1734_s14 = scalar_lea.vmem %s68_s27, 2048  ;;  %p1739_p0 = scmp.lt.s32.totalorder %s68_s27, %s68_s27 }
  0x3d   :  { %p1735_p13 = scmp.ne.s32.totalorder %s68_s27, %s1734_s14  ;;  %p1740_p1 = scmp.lt.s32.totalorder %s1734_s14, %s1734_s14 }
  0x3f   :  { %p1741_p2 = por %p1740_p1, %p1739_p0 }
  0x41   :  { %p1742_p3 = pnand %p1741_p2, %p1735_p13 }
  0x43   :  { %1745 = shalt.err (!%p1742_p3)
}
  0x44   :  { %s1784_s5 = smov 64   ;;  %s1785_s15 = smov 4  }
  0x45   :  { %73 = dma.hbm_to_vmem [thread:$0]  %s1963_s7, 2048, %s68_s27, [#allocation9], %s1784_s5, %s1784_s5, %s1785_s15  }
  0x46   :  { %1768 = dma.done.wait [#allocation3], 4096  }
  0x47   :  { %1769 = vsyncadd [#allocation3], 4294963200 }
  0x48   :  { %1770 = dma.done.wait [#allocation6], 10240  }
  0x49   :  { %1771 = vsyncadd [#allocation6], 4294957056 }
  0x4a   :  { %1772 = dma.done.wait [#allocation9], 2048  }
  0x4b   :  { %1773 = vsyncadd [#allocation9], 4294965248  ;;  %v1786_v0 = vmov 0   ;;  %v1787_v1 = vmov 2   ;;  %v89_v2 = vld [vmem:[%s1956_s0] sm:$0xff]  ;;  %v1788_v11 = vmov 1   ;;  %v90_v21 = vlaneseq }
  0x4c   :  { %1465 = vset.pattern.permute.xlu0 %v1786_v0  ;;  %1467 = vset.pattern.permute.xlu1 %v1787_v1  ;;  %v102_v3 = vadd.s32 20, %v89_v2  ;;  %v1470_v4 = vld [vmem:[#allocation5 + $0x4] ss:$16 sps:$4 sm:$0xff]   ;;  %v96_v5 = vadd.s32 10, %v89_v2  ;;  %v1472_v6 = vld [vmem:[#allocation5] ss:$16 sps:$4 sm:$0xff]  }
  0x4d   :  { %283 = vmatprep.mubr.bf16.mxu1 %v1786_v0  ;;  %93 = vperm.xlu0 %1465, %v89_v2   ;;  %v1473_v7 = vld [vmem:[#allocation5 + $0x24] ss:$16 sps:$4 sm:$0xff]   ;;  %v108_v8 = vadd.s32 30, %v89_v2  ;;  %v1475_v9 = vld [vmem:[#allocation5 + $0x20] ss:$16 sps:$4 sm:$0xff]   ;;  %v1789_v13 = vmov 3  }
  0x4e   :  { %104 = vperm.xlu1 %1467, %v102_v3   ;;  %251 = vmatprep.subr.bf16.mxu1 %v1470_v4  ;;  %v1476_v10 = vld [vmem:[#allocation5 + $0x44] ss:$16 sps:$4 sm:$0xff]   ;;  %v1478_v12 = vld [vmem:[#allocation5 + $0x40] ss:$16 sps:$4 sm:$0xff]   ;;  %v1484_v16 = vld [vmem:[#allocation5 + $0xc] ss:$16 sps:$4 sm:$0xff]  }
  0x4f   :  { %252 = vmatpush1.bf16.msra.mxu1 %v1472_v6  ;;  %v1479_v14 = vld [vmem:[#allocation5 + $0x64] ss:$16 sps:$4 sm:$0xff]   ;;  %v1481_v15 = vld [vmem:[#allocation5 + $0x60] ss:$16 sps:$4 sm:$0xff]   ;;  %v91_v23 = vand.u32 127, %v90_v21  ;;  %v1790_v27 = vmov 0.0  }
  0x50   :  { %253 = vmatprep.subr.bf16.mxu1 %v1473_v7  ;;  %v1542_v17 = vld [vmem:[#allocation7 + $0x4] ss:$8 sps:$4 sm:$0xff]   ;;  %v1544_v18 = vld [vmem:[#allocation7] ss:$8 sps:$4 sm:$0xff]   ;;  %v1545_v19 = vld [vmem:[#allocation7 + $0x14] ss:$8 sps:$4 sm:$0xff]  }
  0x51   :  { %1466 = vset.pattern.permute.xlu0 %v1788_v11  ;;  %1005 = vmatprep.subr.bf16.mxu0 %v1542_v17  ;;  %v1547_v20 = vld [vmem:[#allocation7 + $0x10] ss:$8 sps:$4 sm:$0xff]   ;;  %vm247_vm7 = vcmask 523264   ;;  %v1487_v31 = vld [vmem:[#allocation5 + $0x2c] ss:$16 sps:$4 sm:$0xff]   ;;  %s1791_s25 = smov [#allocation10]  }
  0x52   :  { %98 = vperm.xlu0 %1466, %v96_v5   ;;  %1468 = vset.pattern.permute.xlu1 %v1789_v13  ;;  %v1482_v29 = vld [vmem:[#allocation5 + $0x8] ss:$16 sps:$4 sm:$0xff]   ;;  %v1490_v33 = vld [vmem:[#allocation5 + $0x4c] ss:$16 sps:$4 sm:$0xff]   ;;  %v1496_v37 = vld [vmem:[#allocation2 + $0x4] ss:$16 sps:$4 sm:$0xff]  }
  0x53   :  { %110 = vperm.xlu1 %1468, %v108_v8   ;;  %254 = vmatpush1.bf16.msra.mxu1 %v1475_v9  ;;  %v1485_v32 = vld [vmem:[#allocation5 + $0x28] ss:$16 sps:$4 sm:$0xff]   ;;  %v1493_v35 = vld [vmem:[#allocation5 + $0x6c] ss:$16 sps:$4 sm:$0xff]   ;;  %v1494_v38 = vld [vmem:[#allocation2] ss:$16 sps:$4 sm:$0xff]  }
  0x54   :  { %255 = vmatprep.subr.bf16.mxu1 %v1476_v10  ;;  %1006 = vmatpush1.bf16.msra.mxu0 %v1544_v18  ;;  %v1488_v34 = vld [vmem:[#allocation5 + $0x48] ss:$16 sps:$4 sm:$0xff]   ;;  %v1499_v39 = vld [vmem:[#allocation2 + $0x24] ss:$16 sps:$4 sm:$0xff]   ;;  %v1497_v40 = vld [vmem:[#allocation2 + $0x20] ss:$16 sps:$4 sm:$0xff]  }
  0x55   :  { %1007 = vmatprep.subr.bf16.mxu0 %v1545_v19  ;;  %v1491_v36 = vld [vmem:[#allocation5 + $0x68] ss:$16 sps:$4 sm:$0xff]   ;;  %v1502_v41 = vld [vmem:[#allocation2 + $0x44] ss:$16 sps:$4 sm:$0xff]   ;;  %v1500_v42 = vld [vmem:[#allocation2 + $0x40] ss:$16 sps:$4 sm:$0xff]  }
  0x56   :  { %1469 = vset.pattern.permute.xlu0 %v1789_v13  ;;  %v1505_v43 = vld [vmem:[#allocation2 + $0x64] ss:$16 sps:$4 sm:$0xff]   ;;  %v1503_v44 = vld [vmem:[#allocation2 + $0x60] ss:$16 sps:$4 sm:$0xff]   ;;  %v117_v53 = vld [vmem:[%s1957_s1] sm:$0xff]  ;;  %s1278_s2 = sshll.u32 %s1791_s25, 4  ;;  %s1279_s2 = int_to_ptr.vmem [resolvable:$true] %s1278_s2 }
  0x57   :  { %256 = vmatpush1.bf16.msra.mxu1 %v1478_v12  ;;  %v1508_v45 = vld [vmem:[#allocation2 + $0x84] ss:$16 sps:$4 sm:$0xff]   ;;  %v1506_v46 = vld [vmem:[#allocation2 + $0x80] ss:$16 sps:$4 sm:$0xff]   ;;  %v1520_v54 = vld [vmem:[#allocation2 + $0xc] ss:$16 sps:$4 sm:$0xff]   ;;  %v118_v55 = vpack.c.bf16 %v117_v53, %v117_v53  ;;  %p1751_p5 = scmp.lt.s32.totalorder %s1279_s2, %s1279_s2 }
  0x58   :  { %257 = vmatprep.subr.bf16.mxu1 %v1479_v14  ;;  %1008 = vmatpush1.bf16.msra.mxu0 %v1547_v20  ;;  %v1511_v47 = vld [vmem:[#allocation2 + $0xa4] ss:$16 sps:$4 sm:$0xff]   ;;  %v1509_v48 = vld [vmem:[#allocation2 + $0xa0] ss:$16 sps:$4 sm:$0xff]   ;;  %v1518_v56 = vld [vmem:[#allocation2 + $0x8] ss:$16 sps:$4 sm:$0xff]  }
  0x59   :  { %v1514_v49 = vld [vmem:[#allocation2 + $0xc4] ss:$16 sps:$4 sm:$0xff]   ;;  %v1512_v50 = vld [vmem:[#allocation2 + $0xc0] ss:$16 sps:$4 sm:$0xff]   ;;  %v1523_v57 = vld [vmem:[#allocation2 + $0x2c] ss:$16 sps:$4 sm:$0xff]  }
  0x5a   :  { %v1517_v51 = vld [vmem:[#allocation2 + $0xe4] ss:$16 sps:$4 sm:$0xff]   ;;  %v1515_v52 = vld [vmem:[#allocation2 + $0xe0] ss:$16 sps:$4 sm:$0xff]   ;;  %v1521_v58 = vld [vmem:[#allocation2 + $0x28] ss:$16 sps:$4 sm:$0xff]  }
  0x5b   :  { %258 = vmatpush1.bf16.msra.mxu1 %v1481_v15  ;;  %v1526_v59 = vld [vmem:[#allocation2 + $0x4c] ss:$16 sps:$4 sm:$0xff]   ;;  %v1524_v60 = vld [vmem:[#allocation2 + $0x48] ss:$16 sps:$4 sm:$0xff]   ;;  %v1647_v53 = vld [vmem:[#allocation8 + $0x20] sm:$0xff]   ;;  %s1746_s12 = scalar_lea.vmem %s1279_s2, 128 }
  0x5c   :  { %292 = vmatprep.subr.bf16.mxu1 %v1484_v16  ;;  %v1529_v61 = vld [vmem:[#allocation2 + $0x6c] ss:$16 sps:$4 sm:$0xff]   ;;  %v1527_v62 = vld [vmem:[#allocation2 + $0x68] ss:$16 sps:$4 sm:$0xff]   ;;  %p1747_p4 = scmp.ne.s32.totalorder %s1279_s2, %s1746_s12  ;;  %p1752_p6 = scmp.lt.s32.totalorder %s1746_s12, %s1746_s12 }
  0x5d   :  { %v1532_v63 = vld [vmem:[#allocation2 + $0x8c] ss:$16 sps:$4 sm:$0xff]   ;;  %v1530_v1 = vld [vmem:[#allocation2 + $0x88] ss:$16 sps:$4 sm:$0xff]  }
  0x5e   :  { %v1535_v2 = vld [vmem:[#allocation2 + $0xac] ss:$16 sps:$4 sm:$0xff]   ;;  %v1533_v3 = vld [vmem:[#allocation2 + $0xa8] ss:$16 sps:$4 sm:$0xff]   ;;  %p1753_p7 = por %p1752_p6, %p1751_p5 }
  0x5f   :  { %v1538_v4 = vld [vmem:[#allocation2 + $0xcc] ss:$16 sps:$4 sm:$0xff]   ;;  %v1539_v6 = vld [vmem:[#allocation2 + $0xe8] ss:$16 sps:$4 sm:$0xff]  }
  0x60   :  { %v1541_v5 = vld [vmem:[#allocation2 + $0xec] ss:$16 sps:$4 sm:$0xff]   ;;  %v1550_v8 = vld [vmem:[#allocation7 + $0x20] ss:$8 sps:$4 sm:$0xff]   ;;  %v1553_v10 = vld [vmem:[#allocation7 + $0x30] ss:$8 sps:$4 sm:$0xff]   ;;  %p1754_p8 = pnand %p1753_p7, %p1747_p4 }
  0x61   :  { %v1548_v7 = vld [vmem:[#allocation7 + $0x24] ss:$8 sps:$4 sm:$0xff]   ;;  %v1551_v9 = vld [vmem:[#allocation7 + $0x34] ss:$8 sps:$4 sm:$0xff]   ;;  %v1556_v12 = vld [vmem:[#allocation7 + $0x40] ss:$8 sps:$4 sm:$0xff]  }
  0x62   :  { %1009 = vmatprep.subr.bf16.mxu0 %v1548_v7  ;;  %v1554_v11 = vld [vmem:[#allocation7 + $0x44] ss:$8 sps:$4 sm:$0xff]   ;;  %v1557_v13 = vld [vmem:[#allocation7 + $0x54] ss:$8 sps:$4 sm:$0xff]   ;;  %v1559_v14 = vld [vmem:[#allocation7 + $0x50] ss:$8 sps:$4 sm:$0xff]  }
  0x63   :  { %1010 = vmatpush1.bf16.msra.mxu0 %v1550_v8  ;;  %v1560_v15 = vld [vmem:[#allocation7 + $0x64] ss:$8 sps:$4 sm:$0xff]   ;;  %v1562_v16 = vld [vmem:[#allocation7 + $0x60] ss:$8 sps:$4 sm:$0xff]   ;;  %v1563_v17 = vld [vmem:[#allocation7 + $0x74] ss:$8 sps:$4 sm:$0xff]  }
  0x64   :  { %1011 = vmatprep.subr.bf16.mxu0 %v1551_v9  ;;  %v1565_v18 = vld [vmem:[#allocation7 + $0x70] ss:$8 sps:$4 sm:$0xff]   ;;  %v1566_v19 = vld [vmem:[#allocation7 + $0x84] ss:$8 sps:$4 sm:$0xff]   ;;  %v1568_v20 = vld [vmem:[#allocation7 + $0x80] ss:$8 sps:$4 sm:$0xff]  }
  0x67   :  { %1012 = vmatpush1.bf16.msra.mxu0 %v1553_v10 }
  0x68   :  { %1013 = vmatprep.subr.bf16.mxu0 %v1554_v11  ;;  %v1590_v11 = vld [vmem:[#allocation7 + $0x100] ss:$8 sps:$4 sm:$0xff]  }
  0x6b   :  { %1014 = vmatpush1.bf16.msra.mxu0 %v1556_v12 }
  0x6c   :  { %1015 = vmatprep.subr.bf16.mxu0 %v1557_v13  ;;  %v1595_v13 = vld [vmem:[#allocation7 + $0x114] ss:$8 sps:$4 sm:$0xff]  }
  0x6f   :  { %1016 = vmatpush1.bf16.msra.mxu0 %v1559_v14  ;;  %v1593_v14 = vld [vmem:[#allocation7 + $0x110] ss:$8 sps:$4 sm:$0xff]  }
  0x70   :  { %1017 = vmatprep.subr.bf16.mxu0 %v1560_v15  ;;  %v1598_v15 = vld [vmem:[#allocation7 + $0x124] ss:$8 sps:$4 sm:$0xff]  }
  0x73   :  { %1018 = vmatpush1.bf16.msra.mxu0 %v1562_v16  ;;  %v1596_v16 = vld [vmem:[#allocation7 + $0x120] ss:$8 sps:$4 sm:$0xff]  }
  0x74   :  { %1019 = vmatprep.subr.bf16.mxu0 %v1563_v17  ;;  %v1601_v17 = vld [vmem:[#allocation7 + $0x134] ss:$8 sps:$4 sm:$0xff]  }
  0x77   :  { %1020 = vmatpush1.bf16.msra.mxu0 %v1565_v18  ;;  %v1599_v18 = vld [vmem:[#allocation7 + $0x130] ss:$8 sps:$4 sm:$0xff]  }
  0x78   :  { %1021 = vmatprep.subr.bf16.mxu0 %v1566_v19  ;;  %v1604_v19 = vld [vmem:[#allocation7 + $0x144] ss:$8 sps:$4 sm:$0xff]  }
  0x7b   :  { %1022 = vmatpush1.bf16.msra.mxu0 %v1568_v20  ;;  %v1602_v20 = vld [vmem:[#allocation7 + $0x140] ss:$8 sps:$4 sm:$0xff]  }
  0xcc   :  { %v94_v22 = vpop.permute.xlu0 %93 }
  0xcd   :  { %v105_v24 = vpop.permute.xlu1 %104  ;;  %vm95_vm0 = vcmp.eq.s32.totalorder %v91_v23, %v94_v22  ;;  %v1569_v22 = vld [vmem:[#allocation7 + $0x94] ss:$8 sps:$4 sm:$0xff]  }
  0xce   :  { %vm106_vm2 = vcmp.eq.s32.totalorder %v91_v23, %v105_v24  ;;  %1023 = vmatprep.subr.bf16.mxu0 %v1569_v22  ;;  %v1572_v24 = vld [vmem:[#allocation7 + $0xa4] ss:$8 sps:$4 sm:$0xff]   ;;  %v1607_v22 = vld [vmem:[#allocation7 + $0x154] ss:$8 sps:$4 sm:$0xff]  }
  0xd1   :  { %v99_v25 = vpop.permute.xlu0 %98 }
  0xd2   :  { %vm100_vm1 = vcmp.eq.s32.totalorder %v91_v23, %v99_v25  ;;  %v111_v26 = vpop.permute.xlu1 %110  ;;  %v1574_v25 = vld [vmem:[#allocation7 + $0xa0] ss:$8 sps:$4 sm:$0xff]  }
  0xd3   :  { %vm101_vm3 = vmor %vm95_vm0, %vm100_vm1  ;;  %vm112_vm5 = vcmp.eq.s32.totalorder %v91_v23, %v111_v26  ;;  %v1571_v23 = vld [vmem:[#allocation7 + $0x90] ss:$8 sps:$4 sm:$0xff]   ;;  %v1575_v26 = vld [vmem:[#allocation7 + $0xb4] ss:$8 sps:$4 sm:$0xff]  }
  0xd4   :  { %vm107_vm4 = vmor %vm101_vm3, %vm106_vm2  ;;  %1024 = vmatpush1.bf16.msra.mxu0 %v1571_v23  ;;  %v1605_v23 = vld [vmem:[#allocation7 + $0x150] ss:$8 sps:$4 sm:$0xff]  }
  0xd5   :  { %vm113_vm6 = vmor %vm107_vm4, %vm112_vm5  ;;  %1025 = vmatprep.subr.bf16.mxu0 %v1572_v24 }
  0xd6   :  { %v1289_v28 = vsel %vm113_vm6, 1.0, %v1790_v27  ;;  %v1577_v27 = vld [vmem:[#allocation7 + $0xb0] ss:$8 sps:$4 sm:$0xff]  }
  0xd7   :  { %v116_v30 = vpack.c.bf16 %v1289_v28, %v1289_v28  ;;  %v1578_v28 = vld [vmem:[#allocation7 + $0xc4] ss:$8 sps:$4 sm:$0xff]  }
  0xd8   :  { %1026 = vmatpush1.bf16.msra.mxu0 %v1574_v25  ;;  %v1610_v25 = vld [vmem:[#allocation7 + $0x164] ss:$8 sps:$4 sm:$0xff]  }
  0xd9   :  { %1306 = vmatmul.mubr.msk.bf16.vlgmr.msra.gmra.mrb[0].mxu1 %vm247_vm7, %v116_v30  ;;  %1027 = vmatprep.subr.bf16.mxu0 %v1575_v26 }
  0xda   :  { %293 = vmatpush1.bf16.msra.mxu1 %v1482_v29  ;;  %324 = vmatprep.mubr.bf16.mxu1 %v1786_v0  ;;  %v1580_v29 = vld [vmem:[#allocation7 + $0xc0] ss:$8 sps:$4 sm:$0xff]  }
  0xdb   :  { %294 = vmatprep.subr.bf16.mxu1 %v1487_v31  ;;  %v1583_v31 = vld [vmem:[#allocation7 + $0xd0] ss:$8 sps:$4 sm:$0xff]  }
  0xdc   :  { %1028 = vmatpush1.bf16.msra.mxu0 %v1577_v27 }
  0xdd   :  { %1029 = vmatprep.subr.bf16.mxu0 %v1578_v28  ;;  %v1608_v28 = vld [vmem:[#allocation7 + $0x160] ss:$8 sps:$4 sm:$0xff]  }
  0xde   :  { %295 = vmatpush1.bf16.msra.mxu1 %v1485_v32  ;;  %v1584_v32 = vld [vmem:[#allocation7 + $0xe4] ss:$8 sps:$4 sm:$0xff]  }
  0xdf   :  { %296 = vmatprep.subr.bf16.mxu1 %v1490_v33  ;;  %v1586_v33 = vld [vmem:[#allocation7 + $0xe0] ss:$8 sps:$4 sm:$0xff]  }
  0xe0   :  { %1030 = vmatpush1.bf16.msra.mxu0 %v1580_v29 }
  0xe2   :  { %297 = vmatpush1.bf16.msra.mxu1 %v1488_v34  ;;  %v1587_v34 = vld [vmem:[#allocation7 + $0xf4] ss:$8 sps:$4 sm:$0xff]  }
  0xe3   :  { %298 = vmatprep.subr.bf16.mxu1 %v1493_v35  ;;  %v1589_v35 = vld [vmem:[#allocation7 + $0xf0] ss:$8 sps:$4 sm:$0xff]  }
  0xe6   :  { %299 = vmatpush1.bf16.msra.mxu1 %v1491_v36  ;;  %v1592_v36 = vld [vmem:[#allocation7 + $0x104] ss:$8 sps:$4 sm:$0xff]  }
  0xe7   :  { %493 = vmatprep.subr.bf16.mxu1 %v1496_v37  ;;  %v1912_v37 = vshrl.u32 %v90_v21, 7 }
  0xe9   :  { %1307 = vmatmul.mubr.msk.bf16.vlgmr.msra.gmra.mrb[4].mxu1 %vm247_vm7, %v116_v30  ;;  %v1581_v30 = vld [vmem:[#allocation7 + $0xd4] ss:$8 sps:$4 sm:$0xff]   ;;  %v591_v24 = vsub.s32 3, %v1912_v37 }
  0xea   :  { %494 = vmatpush1.bf16.msra.mxu1 %v1494_v38  ;;  %525 = vmatprep.mubr.bf16.mxu1 %v1786_v0  ;;  %v587_v38 = vsub.s32 2, %v1912_v37 }
  0xeb   :  { %495 = vmatprep.subr.bf16.mxu1 %v1499_v39  ;;  %1031 = vmatprep.subr.bf16.mxu0 %v1581_v30  ;;  %v1918_v39 = vld [vmem:[%s1960_s4] sm:$0xf] }
  0xec   :  { %1032 = vmatpush1.bf16.msra.mxu0 %v1583_v31  ;;  %v592_v27 = vrot.slane %v1918_v39, %v591_v24  ;;  %v1613_v31 = vld [vmem:[#allocation7 + $0x174] ss:$8 sps:$4 sm:$0xff]  }
  0xed   :  { %1033 = vmatprep.subr.bf16.mxu0 %v1584_v32 }
  0xee   :  { %496 = vmatpush1.bf16.msra.mxu1 %v1497_v40  ;;  %v1921_v40 = vrot.slane %v1918_v39, %v587_v38  ;;  %v1611_v38 = vld [vmem:[#allocation7 + $0x170] ss:$8 sps:$4 sm:$0xff]  }
  0xef   :  { %497 = vmatprep.subr.bf16.mxu1 %v1502_v41  ;;  %v1638_v41 = vld [vmem:[#allocation8 + $0x40] sm:$0xff]  }
  0xf0   :  { %1034 = vmatpush1.bf16.msra.mxu0 %v1586_v33 }
  0xf1   :  { %1035 = vmatprep.subr.bf16.mxu0 %v1587_v34 }
  0xf2   :  { %498 = vmatpush1.bf16.msra.mxu1 %v1500_v42  ;;  %v1639_v42 = vld [vmem:[#allocation8] sm:$0xff]  }
  0xf3   :  { %499 = vmatprep.subr.bf16.mxu1 %v1505_v43  ;;  %v1640_v43 = vld [vmem:[#allocation8 + $0x48] sm:$0xff]  }
  0xf4   :  { %1036 = vmatpush1.bf16.msra.mxu0 %v1589_v35 }
  0xf5   :  { %1046 = vmatprep.subr.bf16.mxu0 %v1592_v36 }
  0xf6   :  { %500 = vmatpush1.bf16.msra.mxu1 %v1503_v44  ;;  %v1641_v44 = vld [vmem:[#allocation8 + $0x8] sm:$0xff]  }
  0xf7   :  { %501 = vmatprep.subr.bf16.mxu1 %v1508_v45  ;;  %v1642_v45 = vld [vmem:[#allocation8 + $0x50] sm:$0xff]  }
  0xfa   :  { %502 = vmatpush1.bf16.msra.mxu1 %v1506_v46 }
  0xfb   :  { %503 = vmatprep.subr.bf16.mxu1 %v1511_v47 }
  0xfe   :  { %504 = vmatpush1.bf16.msra.mxu1 %v1509_v48  ;;  %v1643_v48 = vld [vmem:[#allocation8 + $0x10] sm:$0xff]  }
  0xff   :  { %505 = vmatprep.subr.bf16.mxu1 %v1514_v49 }
 0x102   :  { %506 = vmatpush1.bf16.msra.mxu1 %v1512_v50  ;;  %v1644_v50 = vld [vmem:[#allocation8 + $0x58] sm:$0xff]  }
 0x103   :  { %507 = vmatprep.subr.bf16.mxu1 %v1517_v51  ;;  %v1645_v51 = vld [vmem:[#allocation8 + $0x18] sm:$0xff]  }
 0x106   :  { %508 = vmatpush1.bf16.msra.mxu1 %v1515_v52  ;;  %v1646_v52 = vld [vmem:[#allocation8 + $0x60] sm:$0xff]  }
 0x107   :  { %534 = vmatprep.subr.bf16.mxu1 %v1520_v54  ;;  %v1648_v54 = vld [vmem:[#allocation8 + $0x68] sm:$0xff]  }
 0x109   :  { %526 = vmatmul.mubr.bf16.vlgmr.msra.gmra.mrb[8].mxu1 %v118_v55 }
 0x10a   :  { %535 = vmatpush1.bf16.msra.mxu1 %v1518_v56  ;;  %566 = vmatprep.mubr.bf16.mxu1 %v1786_v0  ;;  %v1536_v0 = vld [vmem:[#allocation2 + $0xc8] ss:$16 sps:$4 sm:$0xff]  }
 0x10b   :  { %536 = vmatprep.subr.bf16.mxu1 %v1523_v57 }
 0x10e   :  { %537 = vmatpush1.bf16.msra.mxu1 %v1521_v58 }
 0x10f   :  { %538 = vmatprep.subr.bf16.mxu1 %v1526_v59 }
 0x112   :  { %539 = vmatpush1.bf16.msra.mxu1 %v1524_v60  ;;  %v579_v60 = vsub.s32 0, %v1912_v37 }
 0x113   :  { %540 = vmatprep.subr.bf16.mxu1 %v1529_v61  ;;  %v583_v61 = vsub.s32 1, %v1912_v37 }
 0x116   :  { %541 = vmatpush1.bf16.msra.mxu1 %v1527_v62  ;;  %v580_v62 = vrot.slane %v1918_v39, %v579_v60 }
 0x117   :  { %542 = vmatprep.subr.bf16.mxu1 %v1532_v63 }
 0x11a   :  { %543 = vmatpush1.bf16.msra.mxu1 %v1530_v1  ;;  %v584_v1 = vrot.slane %v1918_v39, %v583_v61  ;;  %v1619_v39 = vld [vmem:[#allocation7 + $0x194] ss:$8 sps:$4 sm:$0xff]  }
 0x11b   :  { %544 = vmatprep.subr.bf16.mxu1 %v1535_v2 }
 0x11e   :  { %545 = vmatpush1.bf16.msra.mxu1 %v1533_v3 }
 0x11f   :  { %546 = vmatprep.subr.bf16.mxu1 %v1538_v4 }
 0x122   :  { %547 = vmatpush1.bf16.msra.mxu1 %v1536_v0 }
 0x123   :  { %548 = vmatprep.subr.bf16.mxu1 %v1541_v5 }
 0x126   :  { %549 = vmatpush1.bf16.msra.mxu1 %v1539_v6 }
 0x127   :  { %1421 = vmatprep.subr.bf16.mxu1 %v1638_v41  ;;  %v1616_v41 = vld [vmem:[#allocation7 + $0x184] ss:$8 sps:$4 sm:$0xff]  }
 0x129   :  { %567 = vmatmul.mubr.bf16.vlgmr.msra.gmra.mrb[12].mxu1 %v118_v55  ;;  %v1649_v55 = vld [vmem:[#allocation8 + $0x28] sm:$0xff]  }
 0x12a   :  { %1422 = vmatpush3.bf16.msra.mxu1 %v1639_v42 }
 0x12b   :  { %1423 = vmatprep.subr.bf16.mxu1 %v1640_v43 }
 0x12e   :  { %1424 = vmatpush3.bf16.msra.mxu1 %v1641_v44  ;;  %v1614_v44 = vld [vmem:[#allocation7 + $0x180] ss:$8 sps:$4 sm:$0xff]  }
 0x12f   :  { %1425 = vmatprep.subr.bf16.mxu1 %v1642_v45  ;;  %v1617_v45 = vld [vmem:[#allocation7 + $0x190] ss:$8 sps:$4 sm:$0xff]  }
 0x132   :  { %1426 = vmatpush3.bf16.msra.mxu1 %v1643_v48  ;;  %v1628_v48 = vld [vmem:[#allocation7 + $0x1c4] ss:$8 sps:$4 sm:$0xff]  }
 0x133   :  { %1427 = vmatprep.subr.bf16.mxu1 %v1644_v50  ;;  %v1631_v50 = vld [vmem:[#allocation7 + $0x1d4] ss:$8 sps:$4 sm:$0xff]  }
 0x136   :  { %1428 = vmatpush3.bf16.msra.mxu1 %v1645_v51  ;;  %v1629_v51 = vld [vmem:[#allocation7 + $0x1d0] ss:$8 sps:$4 sm:$0xff]  }
 0x137   :  { %1429 = vmatprep.subr.bf16.mxu1 %v1646_v52  ;;  %v1634_v52 = vld [vmem:[#allocation7 + $0x1e4] ss:$8 sps:$4 sm:$0xff]  }
 0x13a   :  { %1430 = vmatpush3.bf16.msra.mxu1 %v1647_v53  ;;  %v1632_v53 = vld [vmem:[#allocation7 + $0x1e0] ss:$8 sps:$4 sm:$0xff]  }
 0x13b   :  { %1431 = vmatprep.subr.bf16.mxu1 %v1648_v54  ;;  %v1637_v54 = vld [vmem:[#allocation7 + $0x1f4] ss:$8 sps:$4 sm:$0xff]  }
 0x13e   :  { %1432 = vmatpush3.bf16.msra.mxu1 %v1649_v55  ;;  %v1635_v55 = vld [vmem:[#allocation7 + $0x1f0] ss:$8 sps:$4 sm:$0xff]  }
 0x1ac   :  { %v285_v21 = vpop.f32.mrb[0].mxu1 }
 0x1ad   :  { %v287_v46 = vpop.f32.mrb[1].mxu1 }
 0x1ae   :  { %v289_v47 = vpop.f32.mrb[2].mxu1 }
 0x1af   :  { %v290_v49 = vpop.f32.mrb[3].mxu1  ;;  %v1623_v47 = vld [vmem:[#allocation7 + $0x1b0] ss:$8 sps:$4 sm:$0xff]  }
 0x1b0   :  { %v1626_v49 = vld [vmem:[#allocation7 + $0x1c0] ss:$8 sps:$4 sm:$0xff]  }
 0x1bc   :  { %v326_v56 = vpop.f32.mrb[4].mxu1 }
 0x1bd   :  { %v328_v57 = vpop.f32.mrb[5].mxu1 }
 0x1be   :  { %v330_v58 = vpop.f32.mrb[6].mxu1 }
 0x1bf   :  { %v331_v59 = vpop.f32.mrb[7].mxu1  ;;  %v1650_v58 = vld [vmem:[#allocation8 + $0x70] sm:$0xff]  }
 0x1c0   :  { %v1651_v59 = vld [vmem:[#allocation8 + $0x30] sm:$0xff]   ;;  %1433 = vmatprep.subr.bf16.mxu1 %v1650_v58 }
 0x1c1   :  { %1434 = vmatpush3.bf16.msra.mxu1 %v1651_v59 }
 0x1dc   :  { %v527_v63 = vpop.f32.mrb[8].mxu1 }
 0x1dd   :  { %v528_v2 = vadd.f32 %v527_v63, %v285_v21  ;;  %v529_v3 = vpop.f32.mrb[9].mxu1  ;;  %v1622_v21 = vld [vmem:[#allocation7 + $0x1a4] ss:$8 sps:$4 sm:$0xff]   ;;  %v1653_v63 = vld [vmem:[#allocation8 + $0x38] sm:$0xff]  }
 0x1de   :  { %v530_v4 = vadd.f32 %v529_v3, %v287_v46  ;;  %v531_v0 = vpop.f32.mrb[10].mxu1  ;;  %v1620_v46 = vld [vmem:[#allocation7 + $0x1a0] ss:$8 sps:$4 sm:$0xff]  }
 0x1df   :  { %v597_v5 = vadd.f32 %v580_v62, %v528_v2  ;;  %v532_v6 = vpop.f32.mrb[11].mxu1  ;;  %v1652_v62 = vld [vmem:[#allocation8 + $0x78] sm:$0xff]  }
 0x1e0   :  { %v598_v7 = vadd.f32 %v584_v1, %v530_v4  ;;  %1435 = vmatprep.subr.bf16.mxu1 %v1652_v62  ;;  %v673_v1 = vld [vmem:[%s1962_s6] sm:$0x3] }
 0x1e1   :  { %v601_v8 = vmax.f32 %v597_v5, 0.0  ;;  %1436 = vmatpush3.bf16.msra.mxu1 %v1653_v63  ;;  %v678_v2 = vrot.slane %v673_v1, %v579_v60  ;;  %v682_v3 = vrot.slane %v673_v1, %v583_v61  ;;  %v1404_v60 = vld [vmem:[%s1964_s8] ss:$0 sm:$0xff] }
 0x1e2   :  { %v602_v9 = vmax.f32 %v598_v7, 0.0 }
 0x1e3   :  { %v605_v12 = vpack.c.bf16 %v601_v8, %v601_v8 }
 0x1e4   :  { %v606_v10 = vpack.c.bf16 %v602_v9, %v602_v9 }
 0x1e6   :  { %1037 = vmatprep.mubr.bf16.mxu0 %v606_v10 }
 0x1e7   :  { %1038 = vmatmul.mubr.bf16.vlgmr.msra.gmra.mrb[0].mxu0 %v605_v12 }
 0x1e8   :  { %1047 = vmatpush1.bf16.msra.mxu0 %v1590_v11 }
 0x1e9   :  { %1048 = vmatprep.subr.bf16.mxu0 %v1595_v13 }
 0x1ec   :  { %1049 = vmatpush1.bf16.msra.mxu0 %v1593_v14 }
 0x1ed   :  { %1050 = vmatprep.subr.bf16.mxu0 %v1598_v15 }
 0x1f0   :  { %1051 = vmatpush1.bf16.msra.mxu0 %v1596_v16 }
 0x1f1   :  { %1052 = vmatprep.subr.bf16.mxu0 %v1601_v17 }
 0x1f4   :  { %1053 = vmatpush1.bf16.msra.mxu0 %v1599_v18 }
 0x1f5   :  { %1054 = vmatprep.subr.bf16.mxu0 %v1604_v19 }
 0x1f8   :  { %1055 = vmatpush1.bf16.msra.mxu0 %v1602_v20 }
 0x1f9   :  { %1056 = vmatprep.subr.bf16.mxu0 %v1607_v22 }
 0x1fc   :  { %1057 = vmatpush1.bf16.msra.mxu0 %v1605_v23  ;;  %v568_v26 = vpop.f32.mrb[12].mxu1 }
 0x1fd   :  { %v569_v29 = vadd.f32 %v568_v26, %v326_v56  ;;  %v570_v30 = vpop.f32.mrb[13].mxu1  ;;  %1058 = vmatprep.subr.bf16.mxu0 %v1610_v25 }
 0x1fe   :  { %v571_v32 = vadd.f32 %v570_v30, %v328_v57  ;;  %v572_v33 = vpop.f32.mrb[14].mxu1 }
 0x1ff   :  { %v599_v34 = vadd.f32 %v1921_v40, %v569_v29  ;;  %v573_v35 = vpop.f32.mrb[15].mxu1  ;;  %v1625_v40 = vld [vmem:[#allocation7 + $0x1b4] ss:$8 sps:$4 sm:$0xff]  }
 0x200   :  { %v600_v36 = vadd.f32 %v592_v27, %v571_v32  ;;  %1059 = vmatpush1.bf16.msra.mxu0 %v1608_v28 }
 0x201   :  { %1060 = vmatprep.subr.bf16.mxu0 %v1613_v31  ;;  %v603_v56 = vmax.f32 %v599_v34, 0.0 }
 0x202   :  { %v604_v42 = vmax.f32 %v600_v36, 0.0 }
 0x203   :  { %v607_v57 = vpack.c.bf16 %v603_v56, %v603_v56 }
 0x204   :  { %v608_v43 = vpack.c.bf16 %v604_v42, %v604_v42  ;;  %1061 = vmatpush1.bf16.msra.mxu0 %v1611_v38 }
 0x205   :  { %1062 = vmatprep.subr.bf16.mxu0 %v1616_v41 }
 0x206   :  { %1078 = vmatprep.mubr.bf16.mxu0 %v608_v43 }
 0x208   :  { %1063 = vmatpush1.bf16.msra.mxu0 %v1614_v44 }
 0x209   :  { %1064 = vmatprep.subr.bf16.mxu0 %v1619_v39 }
 0x20c   :  { %1065 = vmatpush1.bf16.msra.mxu0 %v1617_v45 }
 0x20d   :  { %1066 = vmatprep.subr.bf16.mxu0 %v1622_v21 }
 0x210   :  { %1067 = vmatpush1.bf16.msra.mxu0 %v1620_v46 }
 0x211   :  { %1068 = vmatprep.subr.bf16.mxu0 %v1625_v40 }
 0x214   :  { %1069 = vmatpush1.bf16.msra.mxu0 %v1623_v47 }
 0x215   :  { %1070 = vmatprep.subr.bf16.mxu0 %v1628_v48 }
 0x218   :  { %1071 = vmatpush1.bf16.msra.mxu0 %v1626_v49 }
 0x219   :  { %1072 = vmatprep.subr.bf16.mxu0 %v1631_v50 }
 0x21c   :  { %1073 = vmatpush1.bf16.msra.mxu0 %v1629_v51 }
 0x21d   :  { %1074 = vmatprep.subr.bf16.mxu0 %v1634_v52 }
 0x220   :  { %1075 = vmatpush1.bf16.msra.mxu0 %v1632_v53 }
 0x221   :  { %1076 = vmatprep.subr.bf16.mxu0 %v1637_v54 }
 0x224   :  { %1077 = vmatpush1.bf16.msra.mxu0 %v1635_v55 }
 0x227   :  { %1079 = vmatmul.mubr.bf16.vlgmr.msra.gmra.mrb[0].mxu0 %v607_v57 }
 0x2fa   :  { %v1080_v4 = vpop.f32.mrb[0].mxu0 }
 0x2fb   :  { %v1443_v0 = vadd.f32 %v1080_v4, %v678_v2  ;;  %v1082_v5 = vpop.f32.mrb[1].mxu0 }
 0x2fc   :  { %v1444_v6 = vadd.f32 %v1082_v5, %v682_v3  ;;  %v1084_v7 = vpop.f32.mrb[2].mxu0 }
 0x2fd   :  { %v1087_v8 = vmax.f32 %v1443_v0, 0.0  ;;  %v1085_v9 = vpop.f32.mrb[3].mxu0 }
 0x2fe   :  { %v1088_v10 = vmax.f32 %v1444_v6, 0.0 }
 0x2ff   :  { %v1089_v12 = vpack.c.bf16 %v1087_v8, %v1087_v8 }
 0x300   :  { %v1090_v11 = vpack.c.bf16 %v1088_v10, %v1088_v10 }
 0x302   :  { %1258 = vmatprep.mubr.bf16.mxu1 %v1090_v11 }
 0x303   :  { %1259 = vmatmul.mubr.bf16.vlgmr.msra.gmra.mrb[16].mxu1 %v1089_v12 }
 0x3d6   :  { %v1437_v13 = vpop.f32.mrb[16].mxu1 }
 0x3d7   :  { %v1438_v14 = vpop.f32.mrb[17].mxu1 }
 0x3d8   :  { %v1439_v37 = vadd.f32 %v1438_v14, %v1437_v13  ;;  %v1440_v61 = vpop.f32.mrb[18].mxu1 }
 0x3d9   :  { %v1441_v15 = vpop.f32.mrb[19].mxu1 }
 0x3da   :  { %v1261_v16 = vadd.f32 %v1439_v37, %v1404_v60 }
 0x3dc   :  { %v1266_v17 = vsub.f32 0.0, %v1261_v16 }
 0x3de   :  { %v1267_v18 = vmul.f32 1.442695, %v1266_v17 }
 0x3e0   :  { %1654 = vpow2.f32 %v1267_v18 }
 0x3ea   :  { %v1655_v19 = vpop.eup %1654 }
 0x3eb   :  { %v1269_v20 = vadd.f32 1.0, %v1655_v19 }
 0x3ed   :  { %1656 = vrcp.f32 %v1269_v20 }
 0x3f7   :  { %v1657_v22 = vpop.eup %1656 }
 0x3f8   :  { %1271 = vst [vmem:[#allocation10] sm:$0xff] %v1657_v22 }
 0x3f9   :  { %1757 = shalt.err (!%p1754_p8)
}
 0x3fa   :  { %s1758_s22 = scalar_lea.hbm %s1965_s9, 128 }
 0x3fb   :  { %p1759_p9 = scmp.ne.s32.totalorder %s1965_s9, %s1758_s22  ;;  %p1762_p10 = scmp.lt.u32.totalorder %s1758_s22, %s1965_s9 }
 0x3fd   :  { %p1764_p11 = pnand %p1762_p10, %p1759_p9 }
 0x3ff   :  { %1767 = shalt.err (!%p1764_p11)
}
 0x400   :  { %1281 = dma.vmem_to_hbm [thread:$0]  %s1279_s2, 128, %s1965_s9, [#allocation4]  }
 0x401   :  { %1774 = dma.done.wait [#allocation4], 128  }
 0x402   :  { %1775 = vsyncadd [#allocation4], 4294967168 }
 0x403   :  { %1285 = vsyncpa [#allocation3], 1 }
 0x404   :  { %1286 = vsyncpa [#allocation6], 1 }
 0x405   :  { %1287 = vsyncpa [#allocation9], 1 }
 0x406   :  { %1288 = vsyncpa [#allocation4], 1 }

</bundles_post_ra>
